<compile_context>
chip_gen: v6e
topology: v6e:2x2x1
jax: 0.10.0
libtpu: 0.0.40
codegen_flags: <defaults>
</compile_context>

<pallas_src>
import jax
import jax.numpy as jnp
from jax import lax
from jax.experimental import pallas as pl
from jax.experimental.pallas import tpu as pltpu


def _round_up(x, m):
    return ((x + m - 1) // m) * m


def paper_embedding_kernel(idx_ref, scores_ref, num_ref, emb_ref,
                           wt_ref, bt_ref, wn_ref, bn_ref,
                           wft_ref, wfn_ref, bf_ref,
                           out_ref, wsum_acc):
    v = pl.program_id(1)

    @pl.when(v == 0)
    def _():
        wsum_acc[...] = jnp.zeros_like(wsum_acc)

    idx = idx_ref[...]          # [Bt, T] int32
    scores = scores_ref[...]    # [Bt, T] f32
    Bt, T = idx.shape
    Vt = emb_ref.shape[0]

    # Weighted histogram over this vocab slab:
    #   hist[b, j] = sum_t scores[b, t] * (idx[b, t] == v*Vt + j)
    # `local` is hoisted out of the t loop so the iota compare is v-independent.
    local = idx - v * Vt                                       # [Bt, T] int32
    lane_ids = lax.broadcasted_iota(jnp.int32, (1, Vt), 1)     # [1, Vt]

    if T <= 32:
        # Unrolled, two independent partial accumulators (shorter dep chain).
        h0 = jnp.zeros((Bt, Vt), jnp.float32)
        h1 = jnp.zeros((Bt, Vt), jnp.float32)
        for t in range(0, T, 2):
            h0 = h0 + jnp.where(local[:, t:t + 1] == lane_ids,
                                scores[:, t:t + 1], 0.0)
            if t + 1 < T:
                h1 = h1 + jnp.where(local[:, t + 1:t + 2] == lane_ids,
                                    scores[:, t + 1:t + 2], 0.0)
        hist = h0 + h1
    else:
        # Large T: keep code size / vreg pressure bounded.
        def body(t, h):
            li = lax.dynamic_slice_in_dim(local, t, 1, axis=1)
            si = lax.dynamic_slice_in_dim(scores, t, 1, axis=1)
            return h + jnp.where(li == lane_ids, si, 0.0)
        hist = lax.fori_loop(0, T, body, jnp.zeros((Bt, Vt), jnp.float32),
                             unroll=4)

    # weighted_sum[b, e] += hist @ emb_slab  (duplicate indices accumulate;
    # the padding row of the table is zero, matching nn.Embedding(padding_idx)).
    wsum_acc[...] += jnp.dot(hist.astype(emb_ref.dtype), emb_ref[...],
                             preferred_element_type=jnp.float32)

    @pl.when(v == pl.num_programs(1) - 1)
    def _():
        sum_scores = jnp.sum(scores, axis=1, keepdims=True) + 1e-8   # [Bt, 1]
        agg = wsum_acc[...] * pl.reciprocal(sum_scores, approx=True)

        # topic_mlp: Linear + ReLU (K=E dot on MXU, epilogue-only).
        topic_repr = jnp.maximum(
            jnp.dot(agg, wt_ref[...], preferred_element_type=jnp.float32)
            + bt_ref[...], 0.0)

        # numeric_projection: K=F is tiny -> VPU broadcast FMAs, not the MXU.
        num = num_ref[...]                                           # [Bt, F]
        wn = wn_ref[...]                                             # [F, Hp]
        numeric_pre = bn_ref[...]                                    # [1, Hp]
        for f in range(num.shape[1]):
            numeric_pre = numeric_pre + num[:, f:f + 1] * wn[f:f + 1, :]
        numeric_repr = jnp.maximum(numeric_pre, 0.0)                 # [Bt, Hp]

        # fusion_layer on cat([topic_repr, numeric_repr], dim=1):
        #   cat @ Wf == topic_repr @ Wf_top + numeric_repr @ Wf_bottom
        fused = (jnp.dot(topic_repr, wft_ref[...],
                         preferred_element_type=jnp.float32) +
                 jnp.dot(numeric_repr, wfn_ref[...],
                         preferred_element_type=jnp.float32) + bf_ref[...])
        out_ref[...] = jnp.maximum(fused, 0.0)                       # [Bt, Dp]


def paper_embedding_forward(topic_indices, topic_scores, numeric_features, params,
                            *, block_b=512, block_v=2048,
                            table_dtype=jnp.bfloat16):
    emb, wt, bt, wn, bn, wf, bf = (params["emb"], params["wt"], params["bt"],
                                   params["wn"], params["bn"], params["wf"],
                                   params["bf"])
    B, T = topic_indices.shape
    V, E = emb.shape
    F = numeric_features.shape[1]
    H = wt.shape[1]
    D = wf.shape[1]

    # ---- tiled / padded sizes -------------------------------------------------
    Bt = min(block_b, _round_up(B, 8))         # batch tile (multiple of 8)
    Bp = _round_up(B, Bt)
    # v7x has two TensorCores: keep >= 2 batch programs so the "parallel" axis
    # can be sharded across both (accepting a second pass over the table).
    try:
        is_v7 = "v7" in jax.devices()[0].device_kind.lower()
    except Exception:
        is_v7 = False
    if is_v7 and Bp // Bt < 2 and Bt % 16 == 0:
        Bt //= 2
        Bp = _round_up(B, Bt)

    Vt = min(block_v, _round_up(V, 128))       # vocab tile (multiple of 128)
    Vp = _round_up(V, Vt)
    Hp = _round_up(H, 128)                     # lane-dense hidden width
    Dp = _round_up(D, 128)                     # lane-dense output width

    f32 = jnp.float32
    idx_p = jnp.pad(topic_indices.astype(jnp.int32), ((0, Bp - B), (0, 0)))
    sc_p = jnp.pad(topic_scores.astype(f32), ((0, Bp - B), (0, 0)))
    num_p = jnp.pad(numeric_features.astype(f32), ((0, Bp - B), (0, 0)))
    # bf16 table storage halves the dominant HBM stream; accumulation stays f32.
    emb_p = jnp.pad(emb, ((0, Vp - V), (0, 0))).astype(table_dtype)

    # Lane-dense (multiple-of-128) hidden/output dims; padded rows/cols are zero
    # so padded activations stay exactly zero and are sliced off at the end.
    wt_p = jnp.pad(wt.astype(f32), ((0, 0), (0, Hp - H)))
    bt_p = jnp.pad(bt.astype(f32), ((0, 0), (0, Hp - H)))
    wn_p = jnp.pad(wn.astype(f32), ((0, 0), (0, Hp - H)))
    bn_p = jnp.pad(bn.astype(f32), ((0, 0), (0, Hp - H)))
    wf_t = jnp.pad(wf[:H, :].astype(f32), ((0, Hp - H), (0, Dp - D)))
    wf_n = jnp.pad(wf[H:, :].astype(f32), ((0, Hp - H), (0, Dp - D)))
    bf_p = jnp.pad(bf.astype(f32), ((0, 0), (0, Dp - D)))

    grid = (Bp // Bt, Vp // Vt)

    # Explicit VMEM budget (double-buffered pipeline tiles + scratch + weights);
    # raise the scoped limit when big tiles are requested, staying v7x-safe.
    emb_itemsize = emb_p.dtype.itemsize
    vmem_bytes = (2 * (Vt * E * emb_itemsize            # emb slab (double-buffered)
                       + Bt * (2 * T + F) * 4           # idx / scores / num tiles
                       + Bt * Dp * 4)                   # out tile
                  + Bt * E * 4                          # f32 accumulator scratch
                  + 4 * (E * Hp + F * Hp + 2 * Hp * Dp + 3 * Hp + Dp))  # weights
    vmem_limit = int(min(max(2 * vmem_bytes, 32 * 1024 * 1024),
                         64 * 1024 * 1024))

    batch_spec = lambda shape: pl.BlockSpec(shape, lambda i, v: (i, 0))
    const_spec = lambda shape: pl.BlockSpec(shape, lambda i, v: (0, 0))

    out = pl.pallas_call(
        paper_embedding_kernel,
        out_shape=jax.ShapeDtypeStruct((Bp, Dp), f32),
        grid_spec=pltpu.PrefetchScalarGridSpec(
            num_scalar_prefetch=0,
            grid=grid,
            in_specs=[
                batch_spec((Bt, T)),                           # topic_indices
                batch_spec((Bt, T)),                           # topic_scores
                batch_spec((Bt, F)),                           # numeric_features
                pl.BlockSpec((Vt, E), lambda i, v: (v, 0)),    # embedding slab
                const_spec((E, Hp)),                           # wt
                const_spec((1, Hp)),                           # bt
                const_spec((F, Hp)),                           # wn
                const_spec((1, Hp)),                           # bn
                const_spec((Hp, Dp)),                          # wf_topic
                const_spec((Hp, Dp)),                          # wf_numeric
                const_spec((1, Dp)),                           # bf
            ],
            out_specs=pl.BlockSpec((Bt, Dp), lambda i, v: (i, 0)),
            scratch_shapes=[pltpu.VMEM((Bt, E), jnp.float32)],
        ),
        compiler_params=pltpu.CompilerParams(
            dimension_semantics=("parallel", "arbitrary"),
            vmem_limit_bytes=vmem_limit),
    )(idx_p, sc_p, num_p, emb_p, wt_p, bt_p, wn_p, bn_p, wf_t, wf_n, bf_p)

    return out[:B, :D]


def init_params(key, num_topics, embedding_dim, topic_output_dim, pad_idx,
                numeric_feature_dim, final_dim):
    ks = jax.random.split(key, 7)
    emb = 0.1 * jax.random.normal(ks[0], (num_topics, embedding_dim), jnp.float32)
    emb = emb.at[pad_idx].set(0.0)  # padding_idx row is zero
    wt = 0.1 * jax.random.normal(ks[1], (embedding_dim, topic_output_dim), jnp.float32)
    bt = 0.1 * jax.random.normal(ks[2], (1, topic_output_dim), jnp.float32)
    wn = 0.1 * jax.random.normal(ks[3], (numeric_feature_dim, topic_output_dim), jnp.float32)
    bn = 0.1 * jax.random.normal(ks[4], (1, topic_output_dim), jnp.float32)
    wf = 0.1 * jax.random.normal(ks[5], (2 * topic_output_dim, final_dim), jnp.float32)
    bf = 0.1 * jax.random.normal(ks[6], (1, final_dim), jnp.float32)
    return dict(emb=emb, wt=wt, bt=bt, wn=wn, bn=bn, wf=wf, bf=bf)


def reference_forward(topic_indices, topic_scores, numeric_features, params):
    """Pure-JAX f32 reference mirroring the PyTorch forward, for verification."""
    emb = params["emb"][topic_indices]                       # [B,T,E]
    weighted = emb * topic_scores[:, :, None]
    weighted_sum = weighted.sum(axis=1)
    sum_scores = topic_scores.sum(axis=1, keepdims=True) + 1e-8
    agg = weighted_sum / sum_scores
    t = jnp.maximum(agg @ params["wt"] + params["bt"], 0.0)
    n = jnp.maximum(numeric_features @ params["wn"] + params["bn"], 0.0)
    c = jnp.concatenate([t, n], axis=1)
    return jnp.maximum(c @ params["wf"] + params["bf"], 0.0)


if __name__ == "__main__":
    # Small, deterministic config
    num_topics = 32          # vocab size V
    embedding_dim = 32       # E
    topic_output_dim = 32    # H
    pad_idx = 0
    numeric_feature_dim = 2  # F
    final_dim = 16           # D
    B, T = 8, 8              # batch, topics per paper

    key = jax.random.PRNGKey(0)
    k_params, k_idx, k_sc, k_num = jax.random.split(key, 4)

    params = init_params(k_params, num_topics, embedding_dim, topic_output_dim,
                         pad_idx, numeric_feature_dim, final_dim)

    topic_indices = jax.random.randint(k_idx, (B, T), 0, num_topics, dtype=jnp.int32)
    topic_scores = jax.random.uniform(k_sc, (B, T), jnp.float32)
    numeric_features = jax.random.normal(k_num, (B, numeric_feature_dim), jnp.float32)

    out = paper_embedding_forward(topic_indices, topic_scores, numeric_features, params)
    out = jax.block_until_ready(out)

    ref = reference_forward(topic_indices, topic_scores, numeric_features, params)
    assert out.shape == (B, final_dim)
    # Tolerance covers the bf16 table storage + approx reciprocal (both tiny here).
    max_err = float(jnp.max(jnp.abs(out - ref)))
    assert jnp.allclose(out, ref, atol=5e-3, rtol=5e-3), max_err

    print("KERNEL_OK")
</pallas_src>

<mosaic_0001>
module attributes {stable_mosaic.version = 11 : i64} {
  func.func @paper_embedding_kernel(%arg0: i32, %arg1: i32, %arg2: memref<8x8xi32, #tpu.memory_space<vmem>>, %arg3: memref<8x8xf32, #tpu.memory_space<vmem>>, %arg4: memref<8x2xf32, #tpu.memory_space<vmem>>, %arg5: memref<128x32xbf16, #tpu.memory_space<vmem>>, %arg6: memref<32x128xf32, #tpu.memory_space<vmem>>, %arg7: memref<1x128xf32, #tpu.memory_space<vmem>>, %arg8: memref<2x128xf32, #tpu.memory_space<vmem>>, %arg9: memref<1x128xf32, #tpu.memory_space<vmem>>, %arg10: memref<128x128xf32, #tpu.memory_space<vmem>>, %arg11: memref<128x128xf32, #tpu.memory_space<vmem>>, %arg12: memref<1x128xf32, #tpu.memory_space<vmem>>, %arg13: memref<8x128xf32, #tpu.memory_space<vmem>>, %arg14: memref<8x32xf32, #tpu.memory_space<vmem>>) attributes {dimension_semantics = [#tpu.dimension_semantics<parallel>, #tpu.dimension_semantics<arbitrary>], iteration_bounds = array<i64: 1, 1>, scalar_prefetch = 0 : i64, scratch_operands = 1 : i64, tpu.core_type = #tpu.core_type<tc>, window_params = [{transform_indices = @transform_0, window_bounds = array<i64: 8, 8>}, {transform_indices = @transform_1, window_bounds = array<i64: 8, 8>}, {transform_indices = @transform_2, window_bounds = array<i64: 8, 2>}, {transform_indices = @transform_3, window_bounds = array<i64: 128, 32>}, {pipeline_mode = #tpu.pipeline_mode<synchronous>, transform_indices = @transform_4, window_bounds = array<i64: 32, 128>}, {pipeline_mode = #tpu.pipeline_mode<synchronous>, transform_indices = @transform_5, window_bounds = array<i64: 1, 128>}, {pipeline_mode = #tpu.pipeline_mode<synchronous>, transform_indices = @transform_6, window_bounds = array<i64: 2, 128>}, {pipeline_mode = #tpu.pipeline_mode<synchronous>, transform_indices = @transform_7, window_bounds = array<i64: 1, 128>}, {pipeline_mode = #tpu.pipeline_mode<synchronous>, transform_indices = @transform_8, window_bounds = array<i64: 128, 128>}, {pipeline_mode = #tpu.pipeline_mode<synchronous>, transform_indices = @transform_9, window_bounds = array<i64: 128, 128>}, {pipeline_mode = #tpu.pipeline_mode<synchronous>, transform_indices = @transform_10, window_bounds = array<i64: 1, 128>}, {transform_indices = @transform_11, window_bounds = array<i64: 8, 128>}]} {
    %c0_i32 = arith.constant 0 : i32
    %0 = arith.cmpi eq, %arg1, %c0_i32 : i32
    %1 = arith.extui %0 : i1 to i32
    %c0_i32_0 = arith.constant 0 : i32
    %2 = arith.cmpi ne, %1, %c0_i32_0 : i32
    scf.if %2 {
      %cst_22 = arith.constant 0.000000e+00 : f32
      %101 = vector.broadcast %cst_22 : f32 to vector<8x32xf32>
      %c0_23 = arith.constant 0 : index
      %c0_24 = arith.constant 0 : index
      %102 = vector.load %arg14[%c0_23, %c0_24] : memref<8x32xf32, #tpu.memory_space<vmem>>, vector<8x32xf32>
      tpu.vector_store %arg14[%c0_23, %c0_24], %101 {strides = array<i32>} : memref<8x32xf32, #tpu.memory_space<vmem>>, vector<8x32xf32>,
    } else {
    }
    %c0 = arith.constant 0 : index
    %c0_1 = arith.constant 0 : index
    %3 = vector.load %arg2[%c0, %c0_1] : memref<8x8xi32, #tpu.memory_space<vmem>>, vector<8x8xi32>
    %c0_2 = arith.constant 0 : index
    %c0_3 = arith.constant 0 : index
    %4 = vector.load %arg3[%c0_2, %c0_3] : memref<8x8xf32, #tpu.memory_space<vmem>>, vector<8x8xf32>
    %c128_i32 = arith.constant 128 : i32
    %5 = arith.muli %arg1, %c128_i32 : i32
    %6 = vector.broadcast %5 : i32 to vector<8x8xi32>
    %7 = arith.subi %3, %6 : vector<8x8xi32>
    %8 = tpu.iota {dimensions = array<i32: 1>} : vector<1x128xi32>
    %cst = arith.constant 0.000000e+00 : f32
    %9 = vector.broadcast %cst : f32 to vector<8x128xf32>
    %cst_4 = arith.constant 0.000000e+00 : f32
    %10 = vector.broadcast %cst_4 : f32 to vector<8x128xf32>
    %11 = vector.extract_strided_slice %7 {offsets = [0, 0], sizes = [8, 1], strides = [1, 1]} : vector<8x8xi32> to vector<8x1xi32>
    %12 = vector.broadcast %11 : vector<8x1xi32> to vector<8x128xi32>
    %13 = vector.broadcast %8 : vector<1x128xi32> to vector<8x128xi32>
    %14 = arith.cmpi eq, %12, %13 : vector<8x128xi32>
    %15 = vector.extract_strided_slice %4 {offsets = [0, 0], sizes = [8, 1], strides = [1, 1]} : vector<8x8xf32> to vector<8x1xf32>
    %cst_5 = arith.constant 0.000000e+00 : f32
    %16 = vector.shape_cast %15 : vector<8x1xf32> to vector<8x1xf32>
    %17 = vector.broadcast %16 : vector<8x1xf32> to vector<8x128xf32>
    %18 = vector.broadcast %cst_5 : f32 to vector<8x128xf32>
    %19 = arith.select %14, %17, %18 : vector<8x128xi1>, vector<8x128xf32>
    %20 = arith.addf %9, %19 : vector<8x128xf32>
    %21 = vector.extract_strided_slice %7 {offsets = [0, 1], sizes = [8, 1], strides = [1, 1]} : vector<8x8xi32> to vector<8x1xi32>
    %22 = vector.broadcast %21 : vector<8x1xi32> to vector<8x128xi32>
    %23 = vector.broadcast %8 : vector<1x128xi32> to vector<8x128xi32>
    %24 = arith.cmpi eq, %22, %23 : vector<8x128xi32>
    %25 = vector.extract_strided_slice %4 {offsets = [0, 1], sizes = [8, 1], strides = [1, 1]} : vector<8x8xf32> to vector<8x1xf32>
    %cst_6 = arith.constant 0.000000e+00 : f32
    %26 = vector.shape_cast %25 : vector<8x1xf32> to vector<8x1xf32>
    %27 = vector.broadcast %26 : vector<8x1xf32> to vector<8x128xf32>
    %28 = vector.broadcast %cst_6 : f32 to vector<8x128xf32>
    %29 = arith.select %24, %27, %28 : vector<8x128xi1>, vector<8x128xf32>
    %30 = arith.addf %10, %29 : vector<8x128xf32>
    %31 = vector.extract_strided_slice %7 {offsets = [0, 2], sizes = [8, 1], strides = [1, 1]} : vector<8x8xi32> to vector<8x1xi32>
    %32 = vector.broadcast %31 : vector<8x1xi32> to vector<8x128xi32>
    %33 = vector.broadcast %8 : vector<1x128xi32> to vector<8x128xi32>
    %34 = arith.cmpi eq, %32, %33 : vector<8x128xi32>
    %35 = vector.extract_strided_slice %4 {offsets = [0, 2], sizes = [8, 1], strides = [1, 1]} : vector<8x8xf32> to vector<8x1xf32>
    %cst_7 = arith.constant 0.000000e+00 : f32
    %36 = vector.shape_cast %35 : vector<8x1xf32> to vector<8x1xf32>
    %37 = vector.broadcast %36 : vector<8x1xf32> to vector<8x128xf32>
    %38 = vector.broadcast %cst_7 : f32 to vector<8x128xf32>
    %39 = arith.select %34, %37, %38 : vector<8x128xi1>, vector<8x128xf32>
    %40 = arith.addf %20, %39 : vector<8x128xf32>
    %41 = vector.extract_strided_slice %7 {offsets = [0, 3], sizes = [8, 1], strides = [1, 1]} : vector<8x8xi32> to vector<8x1xi32>
    %42 = vector.broadcast %41 : vector<8x1xi32> to vector<8x128xi32>
    %43 = vector.broadcast %8 : vector<1x128xi32> to vector<8x128xi32>
    %44 = arith.cmpi eq, %42, %43 : vector<8x128xi32>
    %45 = vector.extract_strided_slice %4 {offsets = [0, 3], sizes = [8, 1], strides = [1, 1]} : vector<8x8xf32> to vector<8x1xf32>
    %cst_8 = arith.constant 0.000000e+00 : f32
    %46 = vector.shape_cast %45 : vector<8x1xf32> to vector<8x1xf32>
    %47 = vector.broadcast %46 : vector<8x1xf32> to vector<8x128xf32>
    %48 = vector.broadcast %cst_8 : f32 to vector<8x128xf32>
    %49 = arith.select %44, %47, %48 : vector<8x128xi1>, vector<8x128xf32>
    %50 = arith.addf %30, %49 : vector<8x128xf32>
    %51 = vector.extract_strided_slice %7 {offsets = [0, 4], sizes = [8, 1], strides = [1, 1]} : vector<8x8xi32> to vector<8x1xi32>
    %52 = vector.broadcast %51 : vector<8x1xi32> to vector<8x128xi32>
    %53 = vector.broadcast %8 : vector<1x128xi32> to vector<8x128xi32>
    %54 = arith.cmpi eq, %52, %53 : vector<8x128xi32>
    %55 = vector.extract_strided_slice %4 {offsets = [0, 4], sizes = [8, 1], strides = [1, 1]} : vector<8x8xf32> to vector<8x1xf32>
    %cst_9 = arith.constant 0.000000e+00 : f32
    %56 = vector.shape_cast %55 : vector<8x1xf32> to vector<8x1xf32>
    %57 = vector.broadcast %56 : vector<8x1xf32> to vector<8x128xf32>
    %58 = vector.broadcast %cst_9 : f32 to vector<8x128xf32>
    %59 = arith.select %54, %57, %58 : vector<8x128xi1>, vector<8x128xf32>
    %60 = arith.addf %40, %59 : vector<8x128xf32>
    %61 = vector.extract_strided_slice %7 {offsets = [0, 5], sizes = [8, 1], strides = [1, 1]} : vector<8x8xi32> to vector<8x1xi32>
    %62 = vector.broadcast %61 : vector<8x1xi32> to vector<8x128xi32>
    %63 = vector.broadcast %8 : vector<1x128xi32> to vector<8x128xi32>
    %64 = arith.cmpi eq, %62, %63 : vector<8x128xi32>
    %65 = vector.extract_strided_slice %4 {offsets = [0, 5], sizes = [8, 1], strides = [1, 1]} : vector<8x8xf32> to vector<8x1xf32>
    %cst_10 = arith.constant 0.000000e+00 : f32
    %66 = vector.shape_cast %65 : vector<8x1xf32> to vector<8x1xf32>
    %67 = vector.broadcast %66 : vector<8x1xf32> to vector<8x128xf32>
    %68 = vector.broadcast %cst_10 : f32 to vector<8x128xf32>
    %69 = arith.select %64, %67, %68 : vector<8x128xi1>, vector<8x128xf32>
    %70 = arith.addf %50, %69 : vector<8x128xf32>
    %71 = vector.extract_strided_slice %7 {offsets = [0, 6], sizes = [8, 1], strides = [1, 1]} : vector<8x8xi32> to vector<8x1xi32>
    %72 = vector.broadcast %71 : vector<8x1xi32> to vector<8x128xi32>
    %73 = vector.broadcast %8 : vector<1x128xi32> to vector<8x128xi32>
    %74 = arith.cmpi eq, %72, %73 : vector<8x128xi32>
    %75 = vector.extract_strided_slice %4 {offsets = [0, 6], sizes = [8, 1], strides = [1, 1]} : vector<8x8xf32> to vector<8x1xf32>
    %cst_11 = arith.constant 0.000000e+00 : f32
    %76 = vector.shape_cast %75 : vector<8x1xf32> to vector<8x1xf32>
    %77 = vector.broadcast %76 : vector<8x1xf32> to vector<8x128xf32>
    %78 = vector.broadcast %cst_11 : f32 to vector<8x128xf32>
    %79 = arith.select %74, %77, %78 : vector<8x128xi1>, vector<8x128xf32>
    %80 = arith.addf %60, %79 : vector<8x128xf32>
    %81 = vector.extract_strided_slice %7 {offsets = [0, 7], sizes = [8, 1], strides = [1, 1]} : vector<8x8xi32> to vector<8x1xi32>
    %82 = vector.broadcast %81 : vector<8x1xi32> to vector<8x128xi32>
    %83 = vector.broadcast %8 : vector<1x128xi32> to vector<8x128xi32>
    %84 = arith.cmpi eq, %82, %83 : vector<8x128xi32>
    %85 = vector.extract_strided_slice %4 {offsets = [0, 7], sizes = [8, 1], strides = [1, 1]} : vector<8x8xf32> to vector<8x1xf32>
    %cst_12 = arith.constant 0.000000e+00 : f32
    %86 = vector.shape_cast %85 : vector<8x1xf32> to vector<8x1xf32>
    %87 = vector.broadcast %86 : vector<8x1xf32> to vector<8x128xf32>
    %88 = vector.broadcast %cst_12 : f32 to vector<8x128xf32>
    %89 = arith.select %84, %87, %88 : vector<8x128xi1>, vector<8x128xf32>
    %90 = arith.addf %70, %89 : vector<8x128xf32>
    %91 = arith.addf %80, %90 : vector<8x128xf32>
    %c0_13 = arith.constant 0 : index
    %c0_14 = arith.constant 0 : index
    %92 = vector.load %arg14[%c0_13, %c0_14] : memref<8x32xf32, #tpu.memory_space<vmem>>, vector<8x32xf32>
    %93 = arith.truncf %91 : vector<8x128xf32> to vector<8x128xbf16>
    %c0_15 = arith.constant 0 : index
    %c0_16 = arith.constant 0 : index
    %94 = vector.load %arg5[%c0_15, %c0_16] : memref<128x32xbf16, #tpu.memory_space<vmem>>, vector<128x32xbf16>
    %cst_17 = arith.constant dense<0.000000e+00> : vector<8x32xf32>
    %95 = tpu.matmul %93, %94, %cst_17 {dimension_numbers = #tpu.dot_dimension_numbers<[1], [0], [0], [1], [0, 0, 1, 1], [], []>} : vector<8x128xbf16>, vector<128x32xbf16>, vector<8x32xf32> -> vector<8x32xf32>
    %96 = arith.addf %92, %95 : vector<8x32xf32>
    %c0_18 = arith.constant 0 : index
    %c0_19 = arith.constant 0 : index
    %97 = vector.load %arg14[%c0_18, %c0_19] : memref<8x32xf32, #tpu.memory_space<vmem>>, vector<8x32xf32>
    tpu.vector_store %arg14[%c0_18, %c0_19], %96 {strides = array<i32>} : memref<8x32xf32, #tpu.memory_space<vmem>>, vector<8x32xf32>,
    %c0_i32_20 = arith.constant 0 : i32
    %98 = arith.cmpi eq, %arg1, %c0_i32_20 : i32
    %99 = arith.extui %98 : i1 to i32
    %c0_i32_21 = arith.constant 0 : i32
    %100 = arith.cmpi ne, %99, %c0_i32_21 : i32
    scf.if %100 {
      %cst_22 = arith.constant dense<0.000000e+00> : vector<8xf32>
      %101 = vector.multi_reduction <add>, %4, %cst_22 [1] : vector<8x8xf32> to vector<8xf32>
      %102 = vector.shape_cast %101 : vector<8xf32> to vector<8x1xf32>
      %cst_23 = arith.constant 9.99999993E-9 : f32
      %103 = vector.broadcast %cst_23 : f32 to vector<8x1xf32>
      %104 = arith.addf %102, %103 : vector<8x1xf32>
      %c0_24 = arith.constant 0 : index
      %c0_25 = arith.constant 0 : index
      %105 = vector.load %arg14[%c0_24, %c0_25] : memref<8x32xf32, #tpu.memory_space<vmem>>, vector<8x32xf32>
      %106 = tpu.reciprocal %104 {approx = true} : vector<8x1xf32> -> vector<8x1xf32>
      %107 = vector.broadcast %106 : vector<8x1xf32> to vector<8x32xf32>
      %108 = arith.mulf %105, %107 : vector<8x32xf32>
      %c0_26 = arith.constant 0 : index
      %c0_27 = arith.constant 0 : index
      %109 = vector.load %arg6[%c0_26, %c0_27] : memref<32x128xf32, #tpu.memory_space<vmem>>, vector<32x128xf32>
      %cst_28 = arith.constant dense<0.000000e+00> : vector<8x128xf32>
      %110 = tpu.matmul %108, %109, %cst_28 {dimension_numbers = #tpu.dot_dimension_numbers<[1], [0], [0], [1], [0, 0, 1, 1], [], []>} : vector<8x32xf32>, vector<32x128xf32>, vector<8x128xf32> -> vector<8x128xf32>
      %c0_29 = arith.constant 0 : index
      %c0_30 = arith.constant 0 : index
      %111 = vector.load %arg7[%c0_29, %c0_30] : memref<1x128xf32, #tpu.memory_space<vmem>>, vector<1x128xf32>
      %112 = vector.broadcast %111 : vector<1x128xf32> to vector<8x128xf32>
      %113 = arith.addf %110, %112 : vector<8x128xf32>
      %cst_31 = arith.constant 0.000000e+00 : f32
      %114 = vector.broadcast %cst_31 : f32 to vector<8x128xf32>
      %115 = arith.maximumf %113, %114 : vector<8x128xf32>
      %c0_32 = arith.constant 0 : index
      %c0_33 = arith.constant 0 : index
      %116 = vector.load %arg4[%c0_32, %c0_33] : memref<8x2xf32, #tpu.memory_space<vmem>>, vector<8x2xf32>
      %c0_34 = arith.constant 0 : index
      %c0_35 = arith.constant 0 : index
      %117 = vector.load %arg8[%c0_34, %c0_35] : memref<2x128xf32, #tpu.memory_space<vmem>>, vector<2x128xf32>
      %c0_36 = arith.constant 0 : index
      %c0_37 = arith.constant 0 : index
      %118 = vector.load %arg9[%c0_36, %c0_37] : memref<1x128xf32, #tpu.memory_space<vmem>>, vector<1x128xf32>
      %119 = vector.extract_strided_slice %116 {offsets = [0, 0], sizes = [8, 1], strides = [1, 1]} : vector<8x2xf32> to vector<8x1xf32>
      %120 = vector.extract_strided_slice %117 {offsets = [0, 0], sizes = [1, 128], strides = [1, 1]} : vector<2x128xf32> to vector<1x128xf32>
      %121 = vector.broadcast %119 : vector<8x1xf32> to vector<8x128xf32>
      %122 = vector.broadcast %120 : vector<1x128xf32> to vector<8x128xf32>
      %123 = arith.mulf %121, %122 : vector<8x128xf32>
      %124 = vector.broadcast %118 : vector<1x128xf32> to vector<8x128xf32>
      %125 = arith.addf %124, %123 : vector<8x128xf32>
      %126 = vector.extract_strided_slice %116 {offsets = [0, 1], sizes = [8, 1], strides = [1, 1]} : vector<8x2xf32> to vector<8x1xf32>
      %127 = vector.extract_strided_slice %117 {offsets = [1, 0], sizes = [1, 128], strides = [1, 1]} : vector<2x128xf32> to vector<1x128xf32>
      %128 = vector.broadcast %126 : vector<8x1xf32> to vector<8x128xf32>
      %129 = vector.broadcast %127 : vector<1x128xf32> to vector<8x128xf32>
      %130 = arith.mulf %128, %129 : vector<8x128xf32>
      %131 = arith.addf %125, %130 : vector<8x128xf32>
      %cst_38 = arith.constant 0.000000e+00 : f32
      %132 = vector.broadcast %cst_38 : f32 to vector<8x128xf32>
      %133 = arith.maximumf %131, %132 : vector<8x128xf32>
      %c0_39 = arith.constant 0 : index
      %c0_40 = arith.constant 0 : index
      %134 = vector.load %arg10[%c0_39, %c0_40] : memref<128x128xf32, #tpu.memory_space<vmem>>, vector<128x128xf32>
      %cst_41 = arith.constant dense<0.000000e+00> : vector<8x128xf32>
      %135 = tpu.matmul %115, %134, %cst_41 {dimension_numbers = #tpu.dot_dimension_numbers<[1], [0], [0], [1], [0, 0, 1, 1], [], []>} : vector<8x128xf32>, vector<128x128xf32>, vector<8x128xf32> -> vector<8x128xf32>
      %c0_42 = arith.constant 0 : index
      %c0_43 = arith.constant 0 : index
      %136 = vector.load %arg11[%c0_42, %c0_43] : memref<128x128xf32, #tpu.memory_space<vmem>>, vector<128x128xf32>
      %cst_44 = arith.constant dense<0.000000e+00> : vector<8x128xf32>
      %137 = tpu.matmul %133, %136, %cst_44 {dimension_numbers = #tpu.dot_dimension_numbers<[1], [0], [0], [1], [0, 0, 1, 1], [], []>} : vector<8x128xf32>, vector<128x128xf32>, vector<8x128xf32> -> vector<8x128xf32>
      %138 = arith.addf %135, %137 : vector<8x128xf32>
      %c0_45 = arith.constant 0 : index
      %c0_46 = arith.constant 0 : index
      %139 = vector.load %arg12[%c0_45, %c0_46] : memref<1x128xf32, #tpu.memory_space<vmem>>, vector<1x128xf32>
      %140 = vector.broadcast %139 : vector<1x128xf32> to vector<8x128xf32>
      %141 = arith.addf %138, %140 : vector<8x128xf32>
      %cst_47 = arith.constant 0.000000e+00 : f32
      %142 = vector.broadcast %cst_47 : f32 to vector<8x128xf32>
      %143 = arith.maximumf %141, %142 : vector<8x128xf32>
      %c0_48 = arith.constant 0 : index
      %c0_49 = arith.constant 0 : index
      %144 = vector.load %arg13[%c0_48, %c0_49] : memref<8x128xf32, #tpu.memory_space<vmem>>, vector<8x128xf32>
      tpu.vector_store %arg13[%c0_48, %c0_49], %143 {strides = array<i32>} : memref<8x128xf32, #tpu.memory_space<vmem>>, vector<8x128xf32>,
    } else {
    }
    return
  }
  func.func @transform_0(%arg0: i32, %arg1: i32) -> (i32, i32) {
    %c0_i32 = arith.constant 0 : i32
    %c0_i32_0 = arith.constant 0 : i32
    return %arg0, %c0_i32 : i32, i32
  }
  func.func @transform_1(%arg0: i32, %arg1: i32) -> (i32, i32) {
    %c0_i32 = arith.constant 0 : i32
    %c0_i32_0 = arith.constant 0 : i32
    return %arg0, %c0_i32 : i32, i32
  }
  func.func @transform_2(%arg0: i32, %arg1: i32) -> (i32, i32) {
    %c0_i32 = arith.constant 0 : i32
    %c0_i32_0 = arith.constant 0 : i32
    return %arg0, %c0_i32 : i32, i32
  }
  func.func @transform_3(%arg0: i32, %arg1: i32) -> (i32, i32) {
    %c0_i32 = arith.constant 0 : i32
    %c0_i32_0 = arith.constant 0 : i32
    return %arg1, %c0_i32 : i32, i32
  }
  func.func @transform_4(%arg0: i32, %arg1: i32) -> (i32, i32) {
    %c0_i32 = arith.constant 0 : i32
    %c0_i32_0 = arith.constant 0 : i32
    %c0_i32_1 = arith.constant 0 : i32
    return %c0_i32, %c0_i32_0 : i32, i32
  }
  func.func @transform_5(%arg0: i32, %arg1: i32) -> (i32, i32) {
    %c0_i32 = arith.constant 0 : i32
    %c0_i32_0 = arith.constant 0 : i32
    %c0_i32_1 = arith.constant 0 : i32
    return %c0_i32, %c0_i32_0 : i32, i32
  }
  func.func @transform_6(%arg0: i32, %arg1: i32) -> (i32, i32) {
    %c0_i32 = arith.constant 0 : i32
    %c0_i32_0 = arith.constant 0 : i32
    %c0_i32_1 = arith.constant 0 : i32
    return %c0_i32, %c0_i32_0 : i32, i32
  }
  func.func @transform_7(%arg0: i32, %arg1: i32) -> (i32, i32) {
    %c0_i32 = arith.constant 0 : i32
    %c0_i32_0 = arith.constant 0 : i32
    %c0_i32_1 = arith.constant 0 : i32
    return %c0_i32, %c0_i32_0 : i32, i32
  }
  func.func @transform_8(%arg0: i32, %arg1: i32) -> (i32, i32) {
    %c0_i32 = arith.constant 0 : i32
    %c0_i32_0 = arith.constant 0 : i32
    %c0_i32_1 = arith.constant 0 : i32
    return %c0_i32, %c0_i32_0 : i32, i32
  }
  func.func @transform_9(%arg0: i32, %arg1: i32) -> (i32, i32) {
    %c0_i32 = arith.constant 0 : i32
    %c0_i32_0 = arith.constant 0 : i32
    %c0_i32_1 = arith.constant 0 : i32
    return %c0_i32, %c0_i32_0 : i32, i32
  }
  func.func @transform_10(%arg0: i32, %arg1: i32) -> (i32, i32) {
    %c0_i32 = arith.constant 0 : i32
    %c0_i32_0 = arith.constant 0 : i32
    %c0_i32_1 = arith.constant 0 : i32
    return %c0_i32, %c0_i32_0 : i32, i32
  }
  func.func @transform_11(%arg0: i32, %arg1: i32) -> (i32, i32) {
    %c0_i32 = arith.constant 0 : i32
    %c0_i32_0 = arith.constant 0 : i32
    return %arg0, %c0_i32 : i32, i32
  }
}

</mosaic_0001>

<bundles_post_ra>
// kernel: tpu_custom_call.1
= control target key start
LH: loop header
LB: loop body
LE: loop exit
PB: predicated region body
PF: predicated region fallthrough
CT: control target
= control target key end

     0   :  { %16 = vsyncpa [#allocation4], 0  ;;  %s1070_s0 = inlined_call_operand.vmem [shape: s32[8,8], index: 0, kind: input, shape index: {}]   ;;  %s1071_s1 = inlined_call_operand.vmem [shape: f32[8,8], index: 1, kind: input, shape index: {}]   ;;  %s1072_s2 = inlined_call_operand.vmem [shape: f32[8,2], index: 2, kind: input, shape index: {}]   ;;  %s1073_s3 = inlined_call_operand.vmem [shape: bf16[128,32], index: 3, kind: input, shape index: {}]   ;;  %s1074_s4 = inlined_call_operand.vmem [shape: f32[32,128], index: 4, kind: input, shape index: {}]   ;;  %s1075_s5 = inlined_call_operand.vmem [shape: f32[1,128], index: 5, kind: input, shape index: {}]   ;;  %s1076_s6 = inlined_call_operand.vmem [shape: f32[2,128], index: 6, kind: input, shape index: {}]   ;;  %s1077_s7 = inlined_call_operand.vmem [shape: f32[1,128], index: 7, kind: input, shape index: {}]   ;;  %s1078_s8 = inlined_call_operand.hbm [shape: f32[128,128], index: 8, kind: input, shape index: {}]   ;;  %s1079_s9 = inlined_call_operand.hbm [shape: f32[128,128], index: 9, kind: input, shape index: {}]   ;;  %s1080_s10 = inlined_call_operand.vmem [shape: f32[1,128], index: 10, kind: input, shape index: {}]   ;;  %s1081_s11 = inlined_call_operand.hbm [shape: f32[8,128], index: 11, kind: output, shape index: {}]  }
   0x1   :  { %17 = vsyncpa [#allocation7], 0 }
   0x2   :  { %18 = vsyncpa [#allocation5], 0  ;;  %s865_s17 = smov [#allocation3]  }
   0x3   :  { %s40_s18 = sshll.u32 %s865_s17, 4  ;;  %s41_s18 = int_to_ptr.vmem [resolvable:$true] %s40_s18 }
   0x4   :  { %s807_s19 = scalar_lea.vmem %s41_s18, 2048  ;;  %p812_p1 = scmp.lt.s32.totalorder %s41_s18, %s41_s18 }
   0x5   :  { %p808_p0 = scmp.ne.s32.totalorder %s41_s18, %s807_s19  ;;  %p813_p2 = scmp.lt.s32.totalorder %s807_s19, %s807_s19 }
   0x7   :  { %p814_p3 = por %p813_p2, %p812_p1 }
   0x9   :  { %p815_p4 = pnand %p814_p3, %p808_p0 }
   0xb   :  { %818 = shalt.err (!%p815_p4)
}
   0xc   :  { %s866_s20 = smov 128   ;;  %s867_s21 = smov 8  }
   0xd   :  { %46 = dma.hbm_to_vmem [thread:$0]  %s1078_s8, 2048, %s41_s18, [#allocation4], %s866_s20, %s866_s20, %s867_s21  }
   0xe   :  { %s868_s24 = smov [#allocation6]  }
   0xf   :  { %s52_s25 = sshll.u32 %s868_s24, 4  ;;  %s53_s25 = int_to_ptr.vmem [resolvable:$true] %s52_s25 }
  0x10   :  { %s827_s26 = scalar_lea.vmem %s53_s25, 2048  ;;  %p832_p6 = scmp.lt.s32.totalorder %s53_s25, %s53_s25 }
  0x11   :  { %p828_p5 = scmp.ne.s32.totalorder %s53_s25, %s827_s26  ;;  %p833_p7 = scmp.lt.s32.totalorder %s827_s26, %s827_s26 }
  0x13   :  { %p834_p8 = por %p833_p7, %p832_p6 }
  0x15   :  { %p835_p9 = pnand %p834_p8, %p828_p5 }
  0x17   :  { %838 = shalt.err (!%p835_p9)
}
  0x18   :  { %58 = dma.hbm_to_vmem [thread:$0]  %s1079_s9, 2048, %s53_s25, [#allocation7], %s866_s20, %s866_s20, %s867_s21  }
  0x19   :  { %859 = dma.done.wait [#allocation4], 2048  }
  0x1a   :  { %860 = vsyncadd [#allocation4], 4294965248 }
  0x1b   :  { %861 = dma.done.wait [#allocation7], 2048  }
  0x1c   :  { %862 = vsyncadd [#allocation7], 4294965248  ;;  %v869_v0 = vmov 2   ;;  %v870_v1 = vmov 0   ;;  %v74_v2 = vld [vmem:[%s1070_s0] sm:$0xff]  ;;  %v871_v3 = vmov 3   ;;  %v79_v29 = vlaneseq }
  0x1d   :  { %775 = vset.pattern.permute.xlu1 %v869_v0  ;;  %773 = vset.pattern.permute.xlu0 %v870_v1  ;;  %v872_v4 = vmov 1   ;;  %v75_v5 = vld [vmem:[%s1071_s1] sm:$0xff]  ;;  %v789_v6 = vld [vmem:[%s1073_s3 + $0x38] sm:$0xff]   ;;  %v873_v7 = vmov 0.0   ;;  %v790_v8 = vld [vmem:[%s1073_s3 + $0x30] sm:$0xff]   ;;  %v874_v9 = vmov 4  }
  0x1e   :  { %103 = vperm.xlu1 %775, %v74_v2   ;;  %82 = vperm.xlu0 %773, %v74_v2   ;;  %v791_v10 = vld [vmem:[%s1073_s3 + $0x28] sm:$0xff]   ;;  %v875_v11 = vmov 7   ;;  %v876_v12 = vmov 5   ;;  %v792_v13 = vld [vmem:[%s1073_s3 + $0x20] sm:$0xff]   ;;  %v793_v14 = vld [vmem:[%s1073_s3 + $0x18] sm:$0xff]   ;;  %v877_v15 = vmov 6  }
  0x1f   :  { %657 = vmatprep.subr.bf16.mxu0 %v873_v7  ;;  %677 = vmatprep.subr.mxu1 %v873_v7  ;;  %v794_v16 = vld [vmem:[%s1073_s3 + $0x10] sm:$0xff]   ;;  %v795_v17 = vld [vmem:[%s1073_s3 + $0x8] sm:$0xff]   ;;  %v796_v18 = vld [vmem:[%s1073_s3] sm:$0xff]   ;;  %vm878_vm0 = vmmov 0   ;;  %vm275_vm1 = vcmask 64512   ;;  %vm72_vm2 = vcmask 261120  }
  0x20   :  { %658 = vmatpush3.bf16.msra.mxu0 %v789_v6  ;;  %673 = vmatprep.mubr.msk.bf16.mxu0 %vm878_vm0, %v873_v7  ;;  %v276_v19 = vsel %vm275_vm1, %v75_v5, 0.0  ;;  %73 = vst.msk [vmem:[#allocation2] sm:$0xff] %vm72_vm2, %v873_v7  ;;  %v80_v32 = vand.u32 127, %v79_v29  ;;  %v286_v54 = vld [vmem:[%s1074_s4 + $0x18] sm:$0xff]  ;;  %v285_v55 = vld [vmem:[%s1074_s4 + $0x10] sm:$0xff]  ;;  %v284_v56 = vld [vmem:[%s1074_s4 + $0x8] sm:$0xff] }
  0x21   :  { %659 = vmatprep.subr.bf16.mxu0 %v873_v7  ;;  %685 = vmatprep.mubr.msk.f32.mxu1 %vm878_vm0, %v873_v7  ;;  %v283_v57 = vld [vmem:[%s1074_s4] sm:$0xff]  ;;  %v413_v60 = vld [vmem:[#allocation3 + $0x70] sm:$0xff]  ;;  %v412_v61 = vld [vmem:[#allocation3 + $0x68] sm:$0xff]  ;;  %s879_s16 = smov [#allocation8]  }
  0x22   :  { %776 = vset.pattern.permute.xlu1 %v871_v3  ;;  %774 = vset.pattern.permute.xlu0 %v872_v4  ;;  %v368_v58 = vld [vmem:[%s1072_s2] sm:$0xff]  ;;  %v411_v62 = vld [vmem:[#allocation3 + $0x60] sm:$0xff]  ;;  %s587_s17 = sshll.u32 %s879_s16, 4  ;;  %s588_s17 = int_to_ptr.vmem [resolvable:$true] %s587_s17 }
  0x23   :  { %113 = vperm.xlu1 %776, %v74_v2   ;;  %93 = vperm.xlu0 %774, %v74_v2   ;;  %v414_v59 = vld [vmem:[#allocation3 + $0x78] sm:$0xff]  ;;  %v403_v6 = vld [vmem:[#allocation3 + $0x20] sm:$0xff]  ;;  %p844_p11 = scmp.lt.s32.totalorder %s588_s17, %s588_s17 }
  0x24   :  { %660 = vmatpush3.bf16.msra.mxu0 %v790_v8  ;;  %678 = vmatpush3.msra.mxu1 %v286_v54  ;;  %v410_v63 = vld [vmem:[#allocation3 + $0x58] sm:$0xff] }
  0x25   :  { %661 = vmatprep.subr.bf16.mxu0 %v873_v7  ;;  %679 = vmatprep.subr.mxu1 %v873_v7  ;;  %v402_v8 = vld [vmem:[#allocation3 + $0x18] sm:$0xff] }
  0x26   :  { %680 = vmatpush3.msra.mxu1 %v285_v55 }
  0x27   :  { %777 = vset.pattern.permute.xlu1 %v870_v1  ;;  %97 = vperm.xlu0 %774, %v75_v5  }
  0x28   :  { %87 = vperm.xlu1 %777, %v75_v5   ;;  %662 = vmatpush3.bf16.msra.mxu0 %v791_v10 }
  0x29   :  { %663 = vmatprep.subr.bf16.mxu0 %v873_v7  ;;  %681 = vmatprep.subr.mxu1 %v873_v7 }
  0x2a   :  { %682 = vmatpush3.msra.mxu1 %v284_v56 }
  0x2b   :  { %779 = vset.pattern.permute.xlu0 %v871_v3  ;;  %683 = vmatprep.subr.mxu1 %v873_v7  ;;  %v406_v3 = vld [vmem:[#allocation3 + $0x38] sm:$0xff] }
  0x2c   :  { %778 = vset.pattern.permute.xlu1 %v869_v0  ;;  %117 = vperm.xlu0 %779, %v75_v5   ;;  %v409_v0 = vld [vmem:[#allocation3 + $0x50] sm:$0xff] }
  0x2d   :  { %107 = vperm.xlu1 %778, %v75_v5   ;;  %664 = vmatpush3.bf16.msra.mxu0 %v792_v13 }
  0x2e   :  { %665 = vmatprep.subr.bf16.mxu0 %v873_v7  ;;  %684 = vmatpush3.msra.mxu1 %v283_v57 }
  0x2f   :  { %688 = vmatprep.subr.mxu1 %v873_v7 }
  0x30   :  { %782 = vset.pattern.permute.xlu0 %v874_v9 }
  0x31   :  { %780 = vset.pattern.permute.xlu1 %v874_v9  ;;  %127 = vperm.xlu0 %782, %v75_v5  }
  0x32   :  { %123 = vperm.xlu1 %780, %v74_v2   ;;  %666 = vmatpush3.bf16.msra.mxu0 %v793_v14 }
  0x33   :  { %667 = vmatprep.subr.bf16.mxu0 %v873_v7 }
  0x35   :  { %784 = vset.pattern.permute.xlu0 %v875_v11 }
  0x36   :  { %781 = vset.pattern.permute.xlu1 %v876_v12  ;;  %153 = vperm.xlu0 %784, %v74_v2  }
  0x37   :  { %133 = vperm.xlu1 %781, %v74_v2   ;;  %668 = vmatpush3.bf16.msra.mxu0 %v794_v16 }
  0x38   :  { %669 = vmatprep.subr.bf16.mxu0 %v873_v7 }
  0x3a   :  { %788 = vset.pattern.permute.xlu0 %v872_v4 }
  0x3b   :  { %137 = vperm.xlu1 %781, %v75_v5   ;;  %670 = vmatpush3.bf16.msra.mxu0 %v795_v17 }
  0x3c   :  { %671 = vmatprep.subr.bf16.mxu0 %v873_v7 }
  0x3f   :  { %783 = vset.pattern.permute.xlu1 %v877_v15  ;;  %672 = vmatpush3.bf16.msra.mxu0 %v796_v18 }
  0x40   :  { %143 = vperm.xlu1 %783, %v74_v2   ;;  %723 = vmatprep.subr.mxu0 %v873_v7  ;;  %v407_v2 = vld [vmem:[#allocation3 + $0x40] sm:$0xff] }
  0x44   :  { %147 = vperm.xlu1 %783, %v75_v5  }
  0x48   :  { %785 = vset.pattern.permute.xlu1 %v875_v11  ;;  %v163_v11 = vld [vmem:[#allocation2] sm:$0xff] }
  0x49   :  { %157 = vperm.xlu1 %785, %v75_v5   ;;  %v404_v5 = vld [vmem:[#allocation3 + $0x28] sm:$0xff] }
  0x4d   :  { %786 = vset.pattern.permute.xlu1 %v870_v1  ;;  %v408_v1 = vld [vmem:[#allocation3 + $0x48] sm:$0xff] }
  0x4e   :  { %373 = vperm.xlu1 %786, %v368_v58  }
  0x52   :  { %787 = vset.pattern.permute.xlu1 %v872_v4  ;;  %v405_v4 = vld [vmem:[#allocation3 + $0x30] sm:$0xff] }
  0x53   :  { %389 = vperm.xlu1 %787, %v368_v58  }
  0x55   :  { %277 = vadd.xlane.f32.xlu0 %v276_v19 }
  0x99   :  { %v104_v20 = vpop.permute.xlu1 %103  ;;  %v83_v23 = vpop.permute.xlu0 %82 }
  0x9a   :  { %vm105_vm4 = vcmp.eq.s32.totalorder %v104_v20, %v80_v32  ;;  %vm84_vm5 = vcmp.eq.s32.totalorder %v83_v23, %v80_v32  ;;  %v430_v20 = vld [vmem:[#allocation6 + $0x78] sm:$0xff]  ;;  %v427_v23 = vld [vmem:[#allocation6 + $0x60] sm:$0xff] }
  0x9e   :  { %v114_v21 = vpop.permute.xlu1 %113  ;;  %v94_v25 = vpop.permute.xlu0 %93 }
  0x9f   :  { %vm95_vm3 = vcmp.eq.s32.totalorder %v94_v25, %v80_v32  ;;  %vm115_vm6 = vcmp.eq.s32.totalorder %v114_v21, %v80_v32  ;;  %v429_v21 = vld [vmem:[#allocation6 + $0x70] sm:$0xff]  ;;  %v426_v25 = vld [vmem:[#allocation6 + $0x58] sm:$0xff] }
  0xa2   :  { %v98_v27 = vpop.permute.xlu0 %97 }
  0xa3   :  { %v88_v22 = vpop.permute.xlu1 %87  ;;  %v100_v35 = vsel %vm95_vm3, %v98_v27, 0.0 }
  0xa4   :  { %v90_v40 = vsel %vm84_vm5, %v88_v22, 0.0  ;;  %v428_v22 = vld [vmem:[#allocation6 + $0x68] sm:$0xff] }
  0xa7   :  { %v118_v31 = vpop.permute.xlu0 %117 }
  0xa8   :  { %v108_v24 = vpop.permute.xlu1 %107  ;;  %v120_v36 = vsel %vm115_vm6, %v118_v31, 0.0 }
  0xa9   :  { %v110_v37 = vsel %vm105_vm4, %v108_v24, 0.0  ;;  %v121_v43 = vadd.f32 %v120_v36, %v100_v35  ;;  %v377_v24 = vshrl.u32 %v79_v29, 7  ;;  %v423_v29 = vld [vmem:[#allocation6 + $0x40] sm:$0xff]  ;;  %v421_v35 = vld [vmem:[#allocation6 + $0x30] sm:$0xff] }
  0xaa   :  { %v111_v44 = vadd.f32 %v110_v37, %v90_v40  ;;  %v420_v40 = vld [vmem:[#allocation6 + $0x28] sm:$0xff] }
  0xab   :  { %v378_v27 = vsub.s32 0, %v377_v24 }
  0xac   :  { %v128_v33 = vpop.permute.xlu0 %127 }
  0xad   :  { %v124_v26 = vpop.permute.xlu1 %123 }
  0xae   :  { %vm125_vm7 = vcmp.eq.s32.totalorder %v124_v26, %v80_v32  ;;  %v425_v26 = vld [vmem:[#allocation6 + $0x50] sm:$0xff] }
  0xaf   :  { %v130_v41 = vsel %vm125_vm7, %v128_v33, 0.0  ;;  %v394_v33 = vsub.s32 1, %v377_v24 }
  0xb0   :  { %v131_v46 = vadd.f32 %v130_v41, %v111_v44  ;;  %v418_v44 = vld [vmem:[#allocation6 + $0x18] sm:$0xff] }
  0xb1   :  { %v154_v39 = vpop.permute.xlu0 %153 }
  0xb2   :  { %v134_v28 = vpop.permute.xlu1 %133  ;;  %vm155_vm10 = vcmp.eq.s32.totalorder %v154_v39, %v80_v32 }
  0xb3   :  { %vm135_vm8 = vcmp.eq.s32.totalorder %v134_v28, %v80_v32  ;;  %v369_v28 = vld [vmem:[%s1076_s6] sm:$0x3] }
  0xb4   :  { %v395_v37 = vrot.slane %v369_v28, %v394_v33 }
  0xb6   :  { %v138_v30 = vpop.permute.xlu1 %137 }
  0xb7   :  { %v140_v42 = vsel %vm135_vm8, %v138_v30, 0.0  ;;  %v424_v30 = vld [vmem:[#allocation6 + $0x48] sm:$0xff] }
  0xb8   :  { %v141_v47 = vadd.f32 %v140_v42, %v121_v43  ;;  %v419_v42 = vld [vmem:[#allocation6 + $0x20] sm:$0xff] }
  0xbb   :  { %v144_v34 = vpop.permute.xlu1 %143 }
  0xbc   :  { %vm145_vm9 = vcmp.eq.s32.totalorder %v144_v34, %v80_v32  ;;  %v379_v32 = vrot.slane %v369_v28, %v378_v27  ;;  %v422_v34 = vld [vmem:[#allocation6 + $0x38] sm:$0xff] }
  0xbf   :  { %v148_v38 = vpop.permute.xlu1 %147 }
  0xc0   :  { %v150_v45 = vsel %vm145_vm9, %v148_v38, 0.0  ;;  %v607_v38 = vld [vmem:[%s1077_s7] ss:$0 sm:$0xff] }
  0xc1   :  { %v151_v50 = vadd.f32 %v150_v45, %v131_v46  ;;  %v417_v46 = vld [vmem:[#allocation6 + $0x10] sm:$0xff] }
  0xc4   :  { %v158_v48 = vpop.permute.xlu1 %157 }
  0xc5   :  { %v160_v49 = vsel %vm155_vm10, %v158_v48, 0.0 }
  0xc6   :  { %v161_v51 = vadd.f32 %v160_v49, %v141_v47  ;;  %v416_v47 = vld [vmem:[#allocation6 + $0x8] sm:$0xff]  ;;  %v415_v49 = vld [vmem:[#allocation6] sm:$0xff] }
  0xc8   :  { %v162_v52 = vadd.f32 %v161_v51, %v151_v50  ;;  %v401_v50 = vld [vmem:[#allocation3 + $0x10] sm:$0xff]  ;;  %v400_v51 = vld [vmem:[#allocation3 + $0x8] sm:$0xff] }
  0xc9   :  { %v374_v31 = vpop.permute.xlu1 %373 }
  0xca   :  { %v164_v53 = vpack.c.bf16 %v162_v52, %v162_v52  ;;  %v380_v36 = vmul.f32 %v379_v32, %v374_v31  ;;  %v399_v52 = vld [vmem:[#allocation3] sm:$0xff] }
  0xcc   :  { %674 = vmatmul.mubr.bf16.vlgmr.msra.gmra.mxu0 %v164_v53  ;;  %v387_v41 = vadd.f32 %v607_v38, %v380_v36  ;;  %v605_v53 = vld [vmem:[%s1075_s5] ss:$0 sm:$0xff]  ;;  %s839_s5 = scalar_lea.vmem %s588_s17, 128 }
  0xcd   :  { %755 = vmatprep.mubr.msk.f32.mxu0 %vm878_vm0, %v873_v7  ;;  %724 = vmatpush3.msra.mxu0 %v414_v59  ;;  %p840_p10 = scmp.ne.s32.totalorder %s588_s17, %s839_s5  ;;  %p845_p12 = scmp.lt.s32.totalorder %s839_s5, %s839_s5 }
  0xce   :  { %725 = vmatprep.subr.mxu0 %v873_v7  ;;  %v390_v39 = vpop.permute.xlu1 %389 }
  0xcf   :  { %726 = vmatpush3.msra.mxu0 %v413_v60  ;;  %v396_v43 = vmul.f32 %v395_v37, %v390_v39  ;;  %p846_p13 = por %p845_p12, %p844_p11 }
  0xd0   :  { %727 = vmatprep.subr.mxu0 %v873_v7 }
  0xd1   :  { %728 = vmatpush3.msra.mxu0 %v412_v61  ;;  %v397_v45 = vadd.f32 %v396_v43, %v387_v41  ;;  %v608_v61 = vld [vmem:[%s1080_s10] ss:$0 sm:$0xff]  ;;  %p847_p0 = pnand %p846_p13, %p840_p10 }
  0xd2   :  { %729 = vmatprep.subr.mxu0 %v873_v7 }
  0xd3   :  { %730 = vmatpush3.msra.mxu0 %v411_v62  ;;  %v398_v48 = vmax.f32 %v397_v45, 0.0 }
  0xd4   :  { %731 = vmatprep.subr.mxu0 %v873_v7 }
  0xd5   :  { %732 = vmatpush3.msra.mxu0 %v410_v63 }
  0xd6   :  { %733 = vmatprep.subr.mxu0 %v873_v7 }
  0xd7   :  { %734 = vmatpush3.msra.mxu0 %v409_v0 }
  0xd8   :  { %735 = vmatprep.subr.mxu0 %v873_v7 }
  0xd9   :  { %736 = vmatpush3.msra.mxu0 %v408_v1 }
  0xda   :  { %737 = vmatprep.subr.mxu0 %v873_v7 }
  0xdb   :  { %738 = vmatpush3.msra.mxu0 %v407_v2 }
  0xdc   :  { %739 = vmatprep.subr.mxu0 %v873_v7 }
  0xdd   :  { %740 = vmatpush3.msra.mxu0 %v406_v3 }
  0xde   :  { %741 = vmatprep.subr.mxu0 %v873_v7  ;;  %v278_v9 = vpop.xlane.xlu0 %277 }
  0xdf   :  { %742 = vmatpush3.msra.mxu0 %v405_v4  ;;  %v279_v10 = vadd.f32 1e-08, %v278_v9 }
  0xe0   :  { %743 = vmatprep.subr.mxu0 %v873_v7 }
  0xe1   :  { %744 = vmatpush3.msra.mxu0 %v404_v5  ;;  %797 = vrcp.f32 %v279_v10 }
  0xe2   :  { %745 = vmatprep.subr.mxu0 %v873_v7 }
  0xe3   :  { %746 = vmatpush3.msra.mxu0 %v403_v6 }
  0xe4   :  { %747 = vmatprep.subr.mxu0 %v873_v7 }
  0xe5   :  { %748 = vmatpush3.msra.mxu0 %v402_v8 }
  0xe6   :  { %749 = vmatprep.subr.mxu0 %v873_v7 }
  0xe7   :  { %750 = vmatpush3.msra.mxu0 %v401_v50 }
  0xe8   :  { %751 = vmatprep.subr.mxu0 %v873_v7 }
  0xe9   :  { %752 = vmatpush3.msra.mxu0 %v400_v51 }
  0xea   :  { %753 = vmatprep.subr.mxu0 %v873_v7 }
  0xeb   :  { %754 = vmatpush3.msra.mxu0 %v399_v52 }
  0xee   :  { %v798_v17 = vpop.eup %797 }
 0x18c   :  { %v263_v12 = vpop.f32.mrf.mxu0 }
 0x18d   :  { %v269_v13 = vadd.f32 %v263_v12, %v163_v11 }
 0x18e   :  { %v675_v14 = vpop.f32.mrf.mxu0 }
 0x18f   :  { %271 = vst.msk [vmem:[#allocation2] sm:$0xff] %vm72_vm2, %v269_v13 }
 0x190   :  { %v266_v15 = vpop.f32.mrf.mxu0 }
 0x192   :  { %v676_v16 = vpop.f32.mrf.mxu0 }
 0x196   :  { %v280_v18 = vld [vmem:[#allocation2] sm:$0xff] }
 0x197   :  { %v282_v19 = vmul.f32 %v798_v17, %v280_v18 }
 0x199   :  { %686 = vmatmul.mubr.msk.f32.vlgmr.msra.gmra.mxu1 %vm72_vm2, %v282_v19 }
 0x19a   :  { %689 = vmatpush3.msra.mxu1 %v430_v20  ;;  %720 = vmatprep.mubr.msk.f32.mxu1 %vm878_vm0, %v873_v7 }
 0x19b   :  { %690 = vmatprep.subr.mxu1 %v873_v7 }
 0x19c   :  { %691 = vmatpush3.msra.mxu1 %v429_v21 }
 0x19d   :  { %692 = vmatprep.subr.mxu1 %v873_v7 }
 0x19e   :  { %693 = vmatpush3.msra.mxu1 %v428_v22 }
 0x19f   :  { %694 = vmatprep.subr.mxu1 %v873_v7 }
 0x1a0   :  { %695 = vmatpush3.msra.mxu1 %v427_v23 }
 0x1a1   :  { %696 = vmatprep.subr.mxu1 %v873_v7 }
 0x1a2   :  { %697 = vmatpush3.msra.mxu1 %v426_v25 }
 0x1a3   :  { %698 = vmatprep.subr.mxu1 %v873_v7 }
 0x1a4   :  { %699 = vmatpush3.msra.mxu1 %v425_v26 }
 0x1a5   :  { %700 = vmatprep.subr.mxu1 %v873_v7 }
 0x1a6   :  { %701 = vmatpush3.msra.mxu1 %v424_v30 }
 0x1a7   :  { %702 = vmatprep.subr.mxu1 %v873_v7 }
 0x1a8   :  { %703 = vmatpush3.msra.mxu1 %v423_v29 }
 0x1a9   :  { %704 = vmatprep.subr.mxu1 %v873_v7 }
 0x1aa   :  { %705 = vmatpush3.msra.mxu1 %v422_v34 }
 0x1ab   :  { %706 = vmatprep.subr.mxu1 %v873_v7 }
 0x1ac   :  { %707 = vmatpush3.msra.mxu1 %v421_v35 }
 0x1ad   :  { %708 = vmatprep.subr.mxu1 %v873_v7 }
 0x1ae   :  { %709 = vmatpush3.msra.mxu1 %v420_v40 }
 0x1af   :  { %710 = vmatprep.subr.mxu1 %v873_v7 }
 0x1b0   :  { %711 = vmatpush3.msra.mxu1 %v419_v42 }
 0x1b1   :  { %712 = vmatprep.subr.mxu1 %v873_v7 }
 0x1b2   :  { %713 = vmatpush3.msra.mxu1 %v418_v44 }
 0x1b3   :  { %714 = vmatprep.subr.mxu1 %v873_v7 }
 0x1b4   :  { %715 = vmatpush3.msra.mxu1 %v417_v46 }
 0x1b5   :  { %716 = vmatprep.subr.mxu1 %v873_v7 }
 0x1b6   :  { %717 = vmatpush3.msra.mxu1 %v416_v47 }
 0x1b7   :  { %718 = vmatprep.subr.mxu1 %v873_v7 }
 0x1b8   :  { %719 = vmatpush3.msra.mxu1 %v415_v49 }
 0x1b9   :  { %721 = vmatmul.mubr.f32.vlgmr.msra.gmra.mxu1 %v398_v48 }
 0x259   :  { %v363_v54 = vpop.f32.mrf.mxu1 }
 0x25a   :  { %v364_v55 = vadd.f32 %v605_v53, %v363_v54 }
 0x25b   :  { %v687_v56 = vpop.f32.mrf.mxu1 }
 0x25c   :  { %v367_v57 = vmax.f32 %v364_v55, 0.0 }
 0x25e   :  { %756 = vmatmul.mubr.f32.vlgmr.msra.gmra.mxu0 %v367_v57 }
 0x279   :  { %v497_v58 = vpop.f32.mrf.mxu1 }
 0x27b   :  { %v722_v59 = vpop.f32.mrf.mxu1 }
 0x31e   :  { %v567_v60 = vpop.f32.mrf.mxu0 }
 0x31f   :  { %v568_v62 = vadd.f32 %v567_v60, %v497_v58 }
 0x320   :  { %v757_v7 = vpop.f32.mrf.mxu0 }
 0x321   :  { %v578_v63 = vadd.f32 %v608_v61, %v568_v62 }
 0x323   :  { %v579_v0 = vmax.f32 %v578_v63, 0.0 }
 0x325   :  { %580 = vst [vmem:[#allocation8] sm:$0xff] %v579_v0 }
 0x326   :  { %850 = shalt.err (!%p847_p0)
}
 0x327   :  { %590 = dma.vmem_to_hbm [thread:$0]  %s588_s17, 128, %s1081_s11, [#allocation5]  }
 0x328   :  { %863 = dma.done.wait [#allocation5], 128  }
 0x329   :  { %864 = vsyncadd [#allocation5], 4294967168 }
 0x32a   :  { %594 = vsyncpa [#allocation4], 1 }
 0x32b   :  { %595 = vsyncpa [#allocation7], 1 }
 0x32c   :  { %596 = vsyncpa [#allocation5], 1 }

</bundles_post_ra>
